<compile_context>
chip_gen: v5e
topology: v5e:2x2
jax: 0.10.0
libtpu: 0.0.40
codegen_flags: <defaults>
</compile_context>

<pallas_src>
import functools

import jax
import jax.numpy as jnp
import numpy as np
from jax import lax
from jax.experimental import pallas as pl
from jax.experimental.pallas import tpu as pltpu

_NB = 128  # within-block scan width (lane width)


def _downsample_kernel(u_ref, tri_ref, data_ref, out_ref):
    """One block of `Bt` batch elements per grid step.

    u_ref    : [Bt, 1, NOUT]  f32 uniforms in [0, 1), lane-dense
    tri_ref  : [128, 128]     bf16, tri[j, i] = 1 iff j < i (resident constant)
    data_ref : [Bt, Cp, Np]   f32 concat(points, features), channel-major (Np on lanes)
    out_ref  : [Bt, Cp, NOUT] f32 gathered rows, NOUT on the lane axis
    """
    bt, _, np_ = data_ref.shape
    nout = out_ref.shape[2]
    nb = np_ // _NB

    data = data_ref[...]                                      # [Bt, Cp, Np]
    nan_mask = jnp.isnan(data)
    clean = jnp.where(nan_mask, jnp.float32(0.0), data)       # NaNs can't poison the gather
    # Row validity: 1.0 iff no channel is NaN (lane-dense over Np).
    nan_any = jnp.max(nan_mask.astype(jnp.float32), axis=1)   # [Bt, Np]
    valid_f = jnp.float32(1.0) - nan_any                      # [Bt, Np]

    # Two-level exclusive prefix count of valid rows (O(N) VMEM, 128-wide blocks).
    # Right-multiplying the tri constant keeps Np on the lane axis and gives an MXU
    # output width of 128.  pos stays exactly integral: bf16 0/1 products, f32 accum.
    tri = tri_ref[...]                                        # [128, 128] bf16
    boff = jnp.zeros((bt, 1), jnp.float32)
    pos_chunks = []
    for k in range(nb):                                       # nb is small & static
        vblk = valid_f[:, k * _NB:(k + 1) * _NB]              # [Bt, 128]
        within = jnp.dot(vblk.astype(jnp.bfloat16), tri,
                         preferred_element_type=jnp.float32)  # exclusive in-block prefix
        pos_chunks.append(within + boff)
        boff = boff + jnp.sum(vblk, axis=1, keepdims=True)
    pos = pos_chunks[0] if nb == 1 else jnp.concatenate(pos_chunks, axis=1)  # [Bt, Np]
    n_valid = jnp.maximum(boff, jnp.float32(1.0))             # [Bt, 1]

    # Lane-dense random ranks in [0, n_valid).  Exact-integer f32 equality is safe
    # for N < 2^24.
    u = u_ref[...].reshape(bt, nout)                          # [Bt, NOUT]
    rank = jnp.floor(u * n_valid)
    rank = jnp.minimum(rank, n_valid - jnp.float32(1.0))      # [Bt, NOUT]

    # One-hot selection [Bt, Np, NOUT]; invalid rows share `pos` with the next valid
    # row, so they must be masked out explicitly.
    eq = (pos[:, :, None] == rank[:, None, :]).astype(jnp.float32)
    sel = eq * valid_f[:, :, None]                            # [Bt, Np, NOUT]

    # Fused gather for points+features, emitted lane-dense:
    #   out[b, c, t] = sum_n clean[b, c, n] * sel[b, n, t]
    out_ref[...] = lax.dot_general(
        clean, sel, dimension_numbers=(((2,), (1,)), ((0,), (0,))),
        preferred_element_type=jnp.float32)


def _round_up(x: int, m: int) -> int:
    return ((x + m - 1) // m) * m


@functools.partial(jax.jit, static_argnames=("n_points", "seed", "batch_tile"))
def downsample(points, features, n_points: int, seed: int = 0, batch_tile: int = 8):
    """NaN-row filter + random downsample to `n_points` (Pallas TPU kernel)."""
    B, N, D = points.shape
    _, _, F = features.shape
    C = D + F

    bt = min(batch_tile, B)
    Bp = _round_up(B, bt)
    Cp = _round_up(C, 8)             # sublane-aligned channel axis
    Np = _round_up(N, _NB)           # lane-aligned point axis (padded rows = NaN -> invalid)
    NOUT = _round_up(n_points, 128)  # lane-dense output stores (multiple of 256 also fine)

    # Fuse points + features -> one joint validity mask / one gather; channel-major.
    data = jnp.concatenate([points.astype(jnp.float32),
                            features.astype(jnp.float32)], axis=-1)      # [B, N, C]
    data = jnp.pad(data, ((0, Bp - B), (0, 0), (0, Cp - C)))              # zero pad B, C
    data = jnp.pad(data, ((0, 0), (0, Np - N), (0, 0)),
                   constant_values=jnp.nan)                               # NaN pad rows
    data = jnp.transpose(data, (0, 2, 1))                                 # [Bp, Cp, Np]

    # Per-(batch, output-slot) uniforms, generated outside the kernel (no in-kernel PRNG).
    u = jax.random.uniform(jax.random.PRNGKey(seed), (Bp, 1, NOUT), dtype=jnp.float32)

    # 128x128 strictly-triangular constant (tri[j, i] = 1 iff j < i), bf16, resident.
    tri = (jnp.arange(_NB)[:, None] < jnp.arange(_NB)[None, :]).astype(jnp.bfloat16)

    # Explicit scoped-VMEM budget (v5e default is only 16 MiB) with headroom, capped at
    # v7x's 64 MiB physical VMEM.
    block_bytes = 4 * bt * (NOUT + Cp * Np + Cp * NOUT)
    interm_bytes = 4 * bt * (Np * NOUT + Cp * Np + 8 * Np)
    vmem_limit = int(min(64 * 2**20,
                         max(32 * 2**20, 2 * block_bytes + interm_bytes + (1 << 20))))

    cost = pl.CostEstimate(
        flops=2 * Bp * (Np * _NB + Cp * Np * NOUT),
        transcendentals=0,
        bytes_accessed=4 * Bp * (Cp * Np + NOUT + Cp * NOUT) + 2 * _NB * _NB)

    out = pl.pallas_call(
        _downsample_kernel,
        out_shape=jax.ShapeDtypeStruct((Bp, Cp, NOUT), jnp.float32),
        grid=(Bp // bt,),
        in_specs=[
            pl.BlockSpec((bt, 1, NOUT), lambda g: (g, 0, 0)),
            pl.BlockSpec((_NB, _NB), lambda g: (0, 0)),   # constant index -> stays resident
            pl.BlockSpec((bt, Cp, Np), lambda g: (g, 0, 0)),
        ],
        out_specs=pl.BlockSpec((bt, Cp, NOUT), lambda g: (g, 0, 0)),
        compiler_params=pltpu.CompilerParams(
            dimension_semantics=("parallel",),            # megacore / dual-TC friendly
            vmem_limit_bytes=vmem_limit),
        cost_estimate=cost,
    )(u, tri, data)

    out = jnp.transpose(out[:B, :C, :n_points], (0, 2, 1))  # [B, n_points, C]
    return (out[..., :D].astype(points.dtype),
            out[..., D:].astype(features.dtype))


if __name__ == "__main__":
    key = jax.random.PRNGKey(0)
    B, N, D, F, N_POINTS = 2, 16, 3, 4, 8
    kp, kf = jax.random.split(key)
    points = jax.random.normal(kp, (B, N, D), dtype=jnp.float32)
    features = jax.random.normal(kf, (B, N, F), dtype=jnp.float32)

    # Inject NaNs into the same rows of every batch (the torch module's torch.stack of
    # filtered batches implicitly assumes equal valid counts per batch element).
    nan_rows = jnp.array([1, 5, 9, 13])
    points = points.at[:, nan_rows, 0].set(jnp.nan)
    features = features.at[:, nan_rows, 1].set(jnp.nan)

    pts_out, feat_out = downsample(points, features, N_POINTS, seed=0)
    jax.block_until_ready((pts_out, feat_out))

    # Sanity checks: shapes, no NaNs survive, and every sampled (point, feature) pair
    # corresponds to a single valid input row (pairing preserved, values exact).
    pts_np, feat_np = np.asarray(pts_out), np.asarray(feat_out)
    points_np, feats_np = np.asarray(points), np.asarray(features)
    assert pts_np.shape == (B, N_POINTS, D) and feat_np.shape == (B, N_POINTS, F)
    assert not np.isnan(pts_np).any() and not np.isnan(feat_np).any()
    for b in range(B):
        joint_valid = ~(np.isnan(points_np[b]).any(axis=1)
                        | np.isnan(feats_np[b]).any(axis=1))
        valid_rows = np.concatenate([points_np[b], feats_np[b]], axis=1)[joint_valid]
        out_rows = np.concatenate([pts_np[b], feat_np[b]], axis=1)
        dist = np.abs(out_rows[:, None, :] - valid_rows[None, :, :]).sum(-1)
        assert (dist.min(axis=1) < 1e-5).all(), "sampled row not in valid set"
    print("KERNEL_OK")
</pallas_src>

<mosaic_0001>
module attributes {stable_mosaic.version = 11 : i64} {
  func.func @_downsample_kernel(%arg0: i32, %arg1: memref<2x1x128xf32, #tpu.memory_space<vmem>>, %arg2: memref<128x128xbf16, #tpu.memory_space<vmem>>, %arg3: memref<2x8x128xf32, #tpu.memory_space<vmem>>, %arg4: memref<2x8x128xf32, #tpu.memory_space<vmem>>) attributes {dimension_semantics = [#tpu.dimension_semantics<parallel>], iteration_bounds = array<i64: 1>, scalar_prefetch = 0 : i64, scratch_operands = 0 : i64, tpu.core_type = #tpu.core_type<tc>, window_params = [{transform_indices = @transform_0, window_bounds = array<i64: 2, 1, 128>}, {pipeline_mode = #tpu.pipeline_mode<synchronous>, transform_indices = @transform_1, window_bounds = array<i64: 128, 128>}, {transform_indices = @transform_2, window_bounds = array<i64: 2, 8, 128>}, {transform_indices = @transform_3, window_bounds = array<i64: 2, 8, 128>}]} {
    %c0 = arith.constant 0 : index
    %c0_0 = arith.constant 0 : index
    %c0_1 = arith.constant 0 : index
    %0 = vector.load %arg3[%c0, %c0_0, %c0_1] : memref<2x8x128xf32, #tpu.memory_space<vmem>>, vector<2x8x128xf32>
    %1 = arith.cmpf one, %0, %0 : vector<2x8x128xf32>
    %cst = arith.constant 0.000000e+00 : f32
    %2 = vector.broadcast %cst : f32 to vector<2x8x128xf32>
    %3 = arith.select %1, %2, %0 : vector<2x8x128xi1>, vector<2x8x128xf32>
    %4 = arith.extui %1 : vector<2x8x128xi1> to vector<2x8x128xi32>
    %5 = arith.sitofp %4 : vector<2x8x128xi32> to vector<2x8x128xf32>
    %cst_2 = arith.constant dense<0xFF800000> : vector<2x128xf32>
    %6 = vector.multi_reduction <maximumf>, %5, %cst_2 [1] : vector<2x8x128xf32> to vector<2x128xf32>
    %cst_3 = arith.constant 1.000000e+00 : f32
    %7 = vector.broadcast %cst_3 : f32 to vector<2x128xf32>
    %8 = arith.subf %7, %6 : vector<2x128xf32>
    %c0_4 = arith.constant 0 : index
    %c0_5 = arith.constant 0 : index
    %9 = vector.load %arg2[%c0_4, %c0_5] : memref<128x128xbf16, #tpu.memory_space<vmem>>, vector<128x128xbf16>
    %cst_6 = arith.constant 0.000000e+00 : f32
    %10 = vector.broadcast %cst_6 : f32 to vector<2x1xf32>
    %11 = arith.truncf %8 : vector<2x128xf32> to vector<2x128xbf16>
    %cst_7 = arith.constant dense<0.000000e+00> : vector<2x128xf32>
    %12 = tpu.matmul %11, %9, %cst_7 {dimension_numbers = #tpu.dot_dimension_numbers<[1], [0], [0], [1], [0, 0, 1, 1], [], []>} : vector<2x128xbf16>, vector<128x128xbf16>, vector<2x128xf32> -> vector<2x128xf32>
    %13 = vector.broadcast %10 : vector<2x1xf32> to vector<2x128xf32>
    %14 = arith.addf %12, %13 : vector<2x128xf32>
    %cst_8 = arith.constant dense<0.000000e+00> : vector<2xf32>
    %15 = vector.multi_reduction <add>, %8, %cst_8 [1] : vector<2x128xf32> to vector<2xf32>
    %16 = vector.shape_cast %15 : vector<2xf32> to vector<2x1xf32>
    %17 = arith.addf %10, %16 : vector<2x1xf32>
    %cst_9 = arith.constant 1.000000e+00 : f32
    %18 = vector.broadcast %cst_9 : f32 to vector<2x1xf32>
    %19 = arith.maximumf %17, %18 : vector<2x1xf32>
    %c0_10 = arith.constant 0 : index
    %c0_11 = arith.constant 0 : index
    %c0_12 = arith.constant 0 : index
    %20 = vector.load %arg1[%c0_10, %c0_11, %c0_12] : memref<2x1x128xf32, #tpu.memory_space<vmem>>, vector<2x1x128xf32>
    %21 = vector.shape_cast %20 : vector<2x1x128xf32> to vector<2x128xf32>
    %22 = vector.broadcast %19 : vector<2x1xf32> to vector<2x128xf32>
    %23 = arith.mulf %21, %22 : vector<2x128xf32>
    %24 = math.floor %23 : vector<2x128xf32>
    %cst_13 = arith.constant 1.000000e+00 : f32
    %25 = vector.broadcast %cst_13 : f32 to vector<2x1xf32>
    %26 = arith.subf %19, %25 : vector<2x1xf32>
    %27 = vector.broadcast %26 : vector<2x1xf32> to vector<2x128xf32>
    %28 = arith.minimumf %24, %27 : vector<2x128xf32>
    %29 = vector.shape_cast %14 : vector<2x128xf32> to vector<2x128x1xf32>
    %30 = vector.shape_cast %28 : vector<2x128xf32> to vector<2x1x128xf32>
    %31 = vector.broadcast %29 : vector<2x128x1xf32> to vector<2x128x128xf32>
    %32 = vector.broadcast %30 : vector<2x1x128xf32> to vector<2x128x128xf32>
    %33 = arith.cmpf oeq, %31, %32 : vector<2x128x128xf32>
    %34 = arith.extui %33 : vector<2x128x128xi1> to vector<2x128x128xi32>
    %35 = arith.sitofp %34 : vector<2x128x128xi32> to vector<2x128x128xf32>
    %36 = vector.shape_cast %8 : vector<2x128xf32> to vector<2x128x1xf32>
    %37 = vector.broadcast %36 : vector<2x128x1xf32> to vector<2x128x128xf32>
    %38 = arith.mulf %35, %37 : vector<2x128x128xf32>
    %cst_14 = arith.constant dense<0.000000e+00> : vector<2x8x128xf32>
    %39 = tpu.matmul %3, %38, %cst_14 {dimension_numbers = #tpu.dot_dimension_numbers<[2], [1], [1], [2], [0, 0, 0, 1, 1, 2], [0], [0]>} : vector<2x8x128xf32>, vector<2x128x128xf32>, vector<2x8x128xf32> -> vector<2x8x128xf32>
    %c0_15 = arith.constant 0 : index
    %c0_16 = arith.constant 0 : index
    %c0_17 = arith.constant 0 : index
    %40 = vector.load %arg4[%c0_15, %c0_16, %c0_17] : memref<2x8x128xf32, #tpu.memory_space<vmem>>, vector<2x8x128xf32>
    tpu.vector_store %arg4[%c0_15, %c0_16, %c0_17], %39 {strides = array<i32>} : memref<2x8x128xf32, #tpu.memory_space<vmem>>, vector<2x8x128xf32>,
    return
  }
  func.func @transform_0(%arg0: i32) -> (i32, i32, i32) {
    %c0_i32 = arith.constant 0 : i32
    %c0_i32_0 = arith.constant 0 : i32
    %c0_i32_1 = arith.constant 0 : i32
    return %arg0, %c0_i32, %c0_i32_0 : i32, i32, i32
  }
  func.func @transform_1(%arg0: i32) -> (i32, i32) {
    %c0_i32 = arith.constant 0 : i32
    %c0_i32_0 = arith.constant 0 : i32
    %c0_i32_1 = arith.constant 0 : i32
    return %c0_i32, %c0_i32_0 : i32, i32
  }
  func.func @transform_2(%arg0: i32) -> (i32, i32, i32) {
    %c0_i32 = arith.constant 0 : i32
    %c0_i32_0 = arith.constant 0 : i32
    %c0_i32_1 = arith.constant 0 : i32
    return %arg0, %c0_i32, %c0_i32_0 : i32, i32, i32
  }
  func.func @transform_3(%arg0: i32) -> (i32, i32, i32) {
    %c0_i32 = arith.constant 0 : i32
    %c0_i32_0 = arith.constant 0 : i32
    %c0_i32_1 = arith.constant 0 : i32
    return %arg0, %c0_i32, %c0_i32_0 : i32, i32, i32
  }
}

</mosaic_0001>

<bundles_post_ra>
// kernel: downsample.1
= control target key start
LH: loop header
LB: loop body
LE: loop exit
PB: predicated region body
PF: predicated region fallthrough
CT: control target
= control target key end

     0   :  { %v155_v1 = vlaneseq  ;;  %v861_v6 = vmov 0.0   ;;  %vm60_vm2 = vcmask 1041409   ;;  %vm129_vm3 = vcmask 1041408   ;;  %s1282_s1 = inlined_call_operand.vmem [shape: bf16[128,128], index: 1, kind: input, shape index: {}]   ;;  %s1283_s2 = inlined_call_operand.vmem [shape: f32[2,8,128], index: 2, kind: input, shape index: {}]   ;;  %s1284_s0 = inlined_call_operand.vmem [shape: f32[2,1,128], index: 0, kind: input, shape index: {}]   ;;  %s1285_s3 = inlined_call_operand.vmem [shape: f32[2,8,128], index: 3, kind: output, shape index: {}]  }
   0x1   :  { %v798_v0 = vld [vmem:[%s1282_s1 + $0x38] sm:$0xff]  ;;  %v797_v2 = vld [vmem:[%s1282_s1 + $0x30] sm:$0xff]  ;;  %v891_v3 = vld [vmem:[%s1283_s2] sm:$0xff] }
   0x2   :  { %112 = vmatpush.bf16.msra.mxu0 %v798_v0  ;;  %v896_v4 = vld [vmem:[%s1283_s2 + $0x8] sm:$0xff]  ;;  %vm16_vm0 = vcmp.ne.f32.partialorder %v891_v3, %v891_v3  ;;  %v900_v5 = vshrl.u32 %v155_v1, 7  ;;  %v795_v18 = vld [vmem:[%s1282_s1 + $0x20] sm:$0xff]  ;;  %v794_v23 = vld [vmem:[%s1282_s1 + $0x18] sm:$0xff] }
   0x3   :  { %vm17_vm1 = vcmp.ne.f32.partialorder %v896_v4, %v896_v4  ;;  %v720_v7 = vsel %vm16_vm0, 1.0, %v861_v6  ;;  %v796_v12 = vld [vmem:[%s1282_s1 + $0x28] sm:$0xff]  ;;  %v793_v28 = vld [vmem:[%s1282_s1 + $0x10] sm:$0xff]  ;;  %v791_v36 = vld [vmem:[%s1282_s1] sm:$0xff] }
   0x4   :  { %v721_v8 = vsel %vm17_vm1, 1.0, %v861_v6  ;;  %v24_v9 = vrot.slane %v720_v7, 4  ;;  %v913_v10 = vadd.s32 104, %v900_v5  ;;  %v916_v11 = vadd.s32 120, %v900_v5  ;;  %v792_v32 = vld [vmem:[%s1282_s1 + $0x8] sm:$0xff] }
   0x5   :  { %v30_v13 = vrot.slane %v721_v8, 4  ;;  %v922_v14 = vadd.s32 112, %v900_v5  ;;  %v951_v35 = vadd.s32 96, %v900_v5  ;;  %v964_v39 = vadd.s32 88, %v900_v5  ;;  %v136_v59 = vld [vmem:[%s1284_s0 + $0x1] sm:$0x1] }
   0x6   :  { %113 = vmatpush.bf16.msra.mxu0 %v797_v2  ;;  %v25_v15 = vmax.f32 %v720_v7, %v24_v9  ;;  %802 = vset.pattern.permute.xlu1 %v913_v10  ;;  %v968_v40 = vadd.s32 80, %v900_v5  ;;  %v978_v43 = vadd.s32 72, %v900_v5  ;;  %v983_v44 = vadd.s32 64, %v900_v5 }
   0x7   :  { %800 = vset.pattern.permute.xlu2 %v916_v11  ;;  %v31_v16 = vmax.f32 %v721_v8, %v30_v13  ;;  %801 = vset.pattern.permute.xlu0 %v922_v14  ;;  %v199_v45 = vadd.s32 56, %v900_v5  ;;  %v995_v46 = vadd.s32 48, %v900_v5  ;;  %v1003_v47 = vadd.s32 24, %v900_v5 }
   0x8   :  { %v26_v17 = vrot.slane %v25_v15, 2  ;;  %v1009_v48 = vadd.s32 8, %v900_v5  ;;  %v1013_v51 = vadd.s32 32, %v900_v5  ;;  %v1016_v52 = vadd.s32 16, %v900_v5 }
   0x9   :  { %v32_v19 = vrot.slane %v31_v16, 2  ;;  %v1022_v54 = vadd.s32 40, %v900_v5 }
   0xa   :  { %114 = vmatpush.bf16.msra.mxu0 %v796_v12  ;;  %v27_v20 = vmax.f32 %v25_v15, %v26_v17 }
   0xb   :  { %v33_v21 = vmax.f32 %v31_v16, %v32_v19 }
   0xc   :  { %v28_v22 = vrot.slane %v27_v20, 1 }
   0xd   :  { %v34_v24 = vrot.slane %v33_v21, 1 }
   0xe   :  { %115 = vmatpush.bf16.msra.mxu0 %v795_v18  ;;  %v29_v25 = vmax.f32 %v27_v20, %v28_v22 }
   0xf   :  { %v35_v26 = vmax.f32 %v33_v21, %v34_v24 }
  0x10   :  { %v933_v27 = vsub.f32 1.0, %v29_v25 }
  0x11   :  { %v938_v29 = vsub.f32 1.0, %v35_v26 }
  0x12   :  { %116 = vmatpush.bf16.msra.mxu0 %v794_v23  ;;  %v54_v30 = vpack.c.bf16 %v933_v27, %v933_v27 }
  0x13   :  { %v55_v31 = vpack.c.bf16 %v938_v29, %v938_v29  ;;  %628 = vperm.xlu1 %802, %v938_v29   ;;  %640 = vperm.xlu2 %800, %v938_v29   ;;  %v127_v41 = vsel %vm60_vm2, %v938_v29, %v933_v27 }
  0x14   :  { %634 = vperm.xlu0 %801, %v938_v29   ;;  %v58_v33 = vunpack.c.l.b16 %v54_v30  ;;  %v130_v42 = vsel %vm129_vm3, %v127_v41, 0.0 }
  0x15   :  { %v59_v34 = vunpack.c.l.b16 %v55_v31 }
  0x16   :  { %117 = vmatpush.bf16.msra.mxu0 %v793_v28 }
  0x17   :  { %v61_v37 = vsel %vm60_vm2, %v59_v34, %v58_v33 }
  0x18   :  { %v62_v38 = vpack.c.b16 %v61_v37, %v61_v37 }
  0x1a   :  { %118 = vmatpush.bf16.msra.mxu0 %v792_v32 }
  0x1b   :  { %803 = vset.pattern.permute.xlu1 %v951_v35  ;;  %544 = vperm.xlu2 %800, %v933_v27  }
  0x1c   :  { %805 = vset.pattern.permute.xlu0 %v964_v39 }
  0x1e   :  { %119 = vmatpush.bf16.msra.mxu0 %v791_v36 }
  0x21   :  { %120 = vmatmul.bf16.vlgmr.msra.gmra.mxu0 %v62_v38 }
  0x23   :  { %622 = vperm.xlu1 %803, %v938_v29   ;;  %804 = vset.pattern.permute.xlu2 %v922_v14 }
  0x2b   :  { %806 = vset.pattern.permute.xlu1 %v913_v10  ;;  %538 = vperm.xlu2 %804, %v933_v27  }
  0x33   :  { %532 = vperm.xlu1 %806, %v933_v27   ;;  %807 = vset.pattern.permute.xlu2 %v968_v40 }
  0x3b   :  { %808 = vset.pattern.permute.xlu1 %v951_v35  ;;  %610 = vperm.xlu2 %807, %v938_v29  }
  0x3e   :  { %131 = vadd.xlane.f32.xlu0 %v130_v42 }
  0x43   :  { %526 = vperm.xlu1 %808, %v933_v27   ;;  %809 = vset.pattern.permute.xlu2 %v978_v43 }
  0x4b   :  { %810 = vset.pattern.permute.xlu1 %v983_v44  ;;  %604 = vperm.xlu2 %809, %v938_v29  }
  0x52   :  { %616 = vperm.xlu0 %805, %v938_v29  }
  0x53   :  { %598 = vperm.xlu1 %810, %v938_v29   ;;  %811 = vset.pattern.permute.xlu2 %v968_v40 }
  0x5a   :  { %520 = vperm.xlu0 %805, %v933_v27  }
  0x5b   :  { %813 = vset.pattern.permute.xlu1 %v978_v43  ;;  %514 = vperm.xlu2 %811, %v933_v27  }
  0x62   :  { %812 = vset.pattern.permute.xlu0 %v199_v45 }
  0x63   :  { %508 = vperm.xlu1 %813, %v933_v27   ;;  %814 = vset.pattern.permute.xlu2 %v995_v46 }
  0x6a   :  { %592 = vperm.xlu0 %812, %v938_v29  }
  0x6b   :  { %815 = vset.pattern.permute.xlu1 %v983_v44  ;;  %586 = vperm.xlu2 %814, %v938_v29  }
  0x6d   :  { %v1050_v2 = vpop.permute.xlu2 %640 }
  0x72   :  { %816 = vset.pattern.permute.xlu0 %v900_v5 }
  0x73   :  { %502 = vperm.xlu1 %815, %v933_v27   ;;  %819 = vset.pattern.permute.xlu2 %v1003_v47 }
  0x75   :  { %v1053_v7 = vpop.permute.xlu2 %544 }
  0x7b   :  { %817 = vset.pattern.permute.xlu1 %v1009_v48 }
  0x85   :  { %v1058_v8 = vpop.permute.xlu2 %538  ;;  %v1066_v12 = vpop.permute.xlu1 %628 }
  0x86   :  { %v1030_v56 = vpop.permute.xlu0 %634 }
  0x95   :  { %v1061_v9 = vpop.permute.xlu2 %610  ;;  %v1075_v16 = vpop.permute.xlu1 %622 }
  0x9e   :  { %v121_v49 = vpop.f32.mrf.mxu0 }
  0x9f   :  { %v154_v50 = vperm.slane %v121_v49, 0  ;;  %v1027_v55 = vperm.slane %v121_v49, 1 }
  0xa1   :  { %177 = vperm.xlu2 %819, %v154_v50   ;;  %165 = vperm.xlu1 %817, %v154_v50  }
  0xa2   :  { %159 = vperm.xlu0 %816, %v154_v50  }
  0xa5   :  { %v1068_v13 = vpop.permute.xlu2 %604  ;;  %v1084_v19 = vpop.permute.xlu1 %532 }
  0xa6   :  { %v123_v53 = vpop.f32.mrf.mxu0 }
  0xa9   :  { %820 = vset.pattern.permute.xlu2 %v1013_v51  ;;  %818 = vset.pattern.permute.xlu1 %v1016_v52 }
  0xaa   :  { %829 = vset.pattern.permute.xlu0 %v913_v10 }
  0xb1   :  { %183 = vperm.xlu2 %820, %v154_v50   ;;  %171 = vperm.xlu1 %818, %v154_v50   ;;  %v132_v57 = vpop.xlane.xlu0 %131 }
  0xb2   :  { %237 = vperm.xlu0 %829, %v154_v50   ;;  %v1033_v58 = vmax.f32 %v132_v57, 1.0 }
  0xb4   :  { %v139_v60 = vperm.slane %v1033_v58, 1  ;;  %v1040_v61 = vadd.f32 -1.0, %v1033_v58  ;;  %v138_v42 = vperm.slane %v1033_v58, 0 }
  0xb5   :  { %v1077_v17 = vpop.permute.xlu2 %514  ;;  %v1091_v22 = vpop.permute.xlu1 %526 }
  0xb6   :  { %v143_v62 = vmul.f32 %v139_v60, %v136_v59  ;;  %v149_v63 = vperm.slane %v1040_v61, 1 }
  0xb8   :  { %v145_v0 = vfloor.f32 %v143_v62 }
  0xb9   :  { %822 = vset.pattern.permute.xlu2 %v995_v46  ;;  %821 = vset.pattern.permute.xlu1 %v1022_v54 }
  0xba   :  { %834 = vset.pattern.permute.xlu0 %v1016_v52  ;;  %v153_v1 = vmin.f32 %v145_v0, %v149_v63 }
  0xbc   :  { %v1117_v34 = vperm.slane %v153_v1, 0 }
  0xc1   :  { %195 = vperm.xlu2 %822, %v154_v50   ;;  %189 = vperm.xlu1 %821, %v154_v50  }
  0xc2   :  { %268 = vperm.xlu0 %834, %v1027_v55  }
  0xc4   :  { %v1070_v15 = vpop.permute.xlu0 %616 }
  0xc5   :  { %v1086_v20 = vpop.permute.xlu2 %586  ;;  %v1095_v23 = vpop.permute.xlu1 %598 }
  0xc9   :  { %824 = vset.pattern.permute.xlu2 %v983_v44  ;;  %823 = vset.pattern.permute.xlu1 %v199_v45 }
  0xca   :  { %839 = vset.pattern.permute.xlu0 %v199_v45 }
  0xcc   :  { %v1079_v18 = vpop.permute.xlu0 %520 }
  0xd1   :  { %207 = vperm.xlu2 %824, %v154_v50   ;;  %201 = vperm.xlu1 %823, %v154_v50  }
  0xd2   :  { %298 = vperm.xlu0 %839, %v1027_v55  }
  0xd5   :  { %v1103_v26 = vpop.permute.xlu1 %508 }
  0xd9   :  { %826 = vset.pattern.permute.xlu2 %v968_v40  ;;  %825 = vset.pattern.permute.xlu1 %v978_v43 }
  0xda   :  { %844 = vset.pattern.permute.xlu0 %v951_v35 }
  0xdc   :  { %v593_v21 = vpop.permute.xlu0 %592 }
  0xe1   :  { %219 = vperm.xlu2 %826, %v154_v50   ;;  %213 = vperm.xlu1 %825, %v154_v50  }
  0xe2   :  { %328 = vperm.xlu0 %844, %v1027_v55  }
  0xe5   :  { %v1109_v31 = vpop.permute.xlu1 %502 }
  0xe9   :  { %828 = vset.pattern.permute.xlu2 %v951_v35  ;;  %827 = vset.pattern.permute.xlu1 %v964_v39 }
  0xea   :  { %848 = vset.pattern.permute.xlu0 %v199_v45 }
  0xf1   :  { %231 = vperm.xlu2 %828, %v154_v50   ;;  %225 = vperm.xlu1 %827, %v154_v50  }
  0xf2   :  { %496 = vperm.xlu0 %848, %v933_v27  }
  0xf9   :  { %831 = vset.pattern.permute.xlu2 %v916_v11  ;;  %830 = vset.pattern.permute.xlu1 %v922_v14 }
  0xfa   :  { %852 = vset.pattern.permute.xlu0 %v1003_v47 }
  0xfb   :  { %v1097_v24 = vpop.permute.xlu2 %177 }
 0x101   :  { %249 = vperm.xlu2 %831, %v154_v50   ;;  %243 = vperm.xlu1 %830, %v154_v50   ;;  %v148_v50 = vperm.slane %v1040_v61, 0 }
 0x102   :  { %568 = vperm.xlu0 %852, %v938_v29  }
 0x109   :  { %833 = vset.pattern.permute.xlu2 %v1009_v48  ;;  %832 = vset.pattern.permute.xlu1 %v900_v5 }
 0x10a   :  { %472 = vperm.xlu0 %852, %v933_v27  }
 0x10b   :  { %v1105_v28 = vpop.permute.xlu2 %183 }
 0x111   :  { %262 = vperm.xlu2 %833, %v1027_v55   ;;  %256 = vperm.xlu1 %832, %v1027_v55  }
 0x112   :  { %859 = vset.pattern.permute.xlu0 %v1009_v48 }
 0x113   :  { %v1119_v35 = vpop.permute.xlu1 %165 }
 0x114   :  { %v1099_v25 = vpop.permute.xlu0 %159 }
 0x119   :  { %836 = vset.pattern.permute.xlu2 %v1013_v51  ;;  %835 = vset.pattern.permute.xlu1 %v1003_v47 }
 0x11a   :  { %460 = vperm.xlu0 %859, %v933_v27  }
 0x11b   :  { %v1111_v32 = vpop.permute.xlu2 %195 }
 0x121   :  { %280 = vperm.xlu2 %836, %v1027_v55   ;;  %274 = vperm.xlu1 %835, %v1027_v55  }
 0x122   :  { %860 = vset.pattern.permute.xlu0 %v916_v11 }
 0x124   :  { %v238_v30 = vpop.permute.xlu0 %237 }
 0x129   :  { %838 = vset.pattern.permute.xlu2 %v995_v46  ;;  %837 = vset.pattern.permute.xlu1 %v1022_v54 }
 0x12b   :  { %v1121_v36 = vpop.permute.xlu2 %207 }
 0x131   :  { %292 = vperm.xlu2 %838, %v1027_v55   ;;  %286 = vperm.xlu1 %837, %v1027_v55  }
 0x134   :  { %v1113_v33 = vpop.permute.xlu0 %268 }
 0x139   :  { %841 = vset.pattern.permute.xlu2 %v978_v43  ;;  %840 = vset.pattern.permute.xlu1 %v983_v44  ;;  %v135_v43 = vld [vmem:[%s1284_s0] sm:$0x1]  ;;  %v1133_v44 = vpop.permute.xlu1 %171 }
 0x13a   :  { %v142_v47 = vmul.f32 %v138_v42, %v135_v43 }
 0x13b   :  { %v220_v45 = vpop.permute.xlu2 %219 }
 0x13c   :  { %v144_v49 = vfloor.f32 %v142_v47 }
 0x13e   :  { %v152_v53 = vmin.f32 %v144_v49, %v148_v50 }
 0x140   :  { %v1142_v57 = vperm.slane %v152_v53, 0 }
 0x141   :  { %310 = vperm.xlu2 %841, %v1027_v55   ;;  %304 = vperm.xlu1 %840, %v1027_v55  }
 0x142   :  { %vm367_vm6 = vcmp.eq.f32.partialorder %v238_v30, %v1142_v57  ;;  %vm364_vm10 = vcmp.eq.f32.partialorder %v220_v45, %v1142_v57  ;;  %vm362_vm12 = vcmp.eq.f32.partialorder %v1121_v36, %v1142_v57  ;;  %vm360_vm15 = vcmp.eq.f32.partialorder %v1111_v32, %v1142_v57 }
 0x143   :  { %v768_v63 = vsel %vm367_vm6, 1.0, %v861_v6  ;;  %v765_v30 = vsel %vm364_vm10, 1.0, %v861_v6 }
 0x144   :  { %v299_v37 = vpop.permute.xlu0 %298 }
 0x145   :  { %vm377_vm4 = vcmp.eq.f32.partialorder %v299_v37, %v1117_v34 }
 0x146   :  { %v778_v38 = vsel %vm377_vm4, 1.0, %v861_v6 }
 0x147   :  { %v1125_v41 = vmul.f32 %v778_v38, %v593_v21  ;;  %v763_v38 = vsel %vm362_vm12, 1.0, %v861_v6 }
 0x149   :  { %843 = vset.pattern.permute.xlu2 %v964_v39  ;;  %842 = vset.pattern.permute.xlu1 %v968_v40  ;;  %v1138_v39 = vpop.permute.xlu1 %189 }
 0x14b   :  { %v232_v40 = vpop.permute.xlu2 %231 }
 0x14c   :  { %vm366_vm7 = vcmp.eq.f32.partialorder %v232_v40, %v1142_v57 }
 0x14d   :  { %v767_v1 = vsel %vm366_vm7, 1.0, %v861_v6 }
 0x151   :  { %322 = vperm.xlu2 %843, %v1027_v55   ;;  %316 = vperm.xlu1 %842, %v1027_v55   ;;  %v202_v58 = vpop.permute.xlu1 %201 }
 0x152   :  { %vm361_vm13 = vcmp.eq.f32.partialorder %v202_v58, %v1142_v57 }
 0x153   :  { %v762_v36 = vsel %vm361_vm13, 1.0, %v861_v6  ;;  %vm372_vm13 = vcmp.eq.f32.partialorder %v1113_v33, %v1117_v34 }
 0x159   :  { %846 = vset.pattern.permute.xlu2 %v916_v11  ;;  %845 = vset.pattern.permute.xlu1 %v913_v10  ;;  %v214_v61 = vpop.permute.xlu1 %213 }
 0x15a   :  { %vm363_vm11 = vcmp.eq.f32.partialorder %v214_v61, %v1142_v57 }
 0x15b   :  { %v250_v59 = vpop.permute.xlu2 %249  ;;  %v764_v37 = vsel %vm363_vm11, 1.0, %v861_v6 }
 0x15c   :  { %vm369_vm5 = vcmp.eq.f32.partialorder %v250_v59, %v1142_v57 }
 0x15d   :  { %v770_v60 = vsel %vm369_vm5, 1.0, %v861_v6 }
 0x15e   :  { %v657_v62 = vmul.f32 %v770_v60, %v1053_v7  ;;  %v1163_v7 = vpop.permute.xlu0 %328 }
 0x15f   :  { %vm382_vm3 = vcmp.eq.f32.partialorder %v1163_v7, %v1117_v34 }
 0x160   :  { %674 = vmatpush.msra.mxu1 %v657_v62  ;;  %v783_v61 = vsel %vm382_vm3, 1.0, %v861_v6  ;;  %vm357_vm3 = vcmp.eq.f32.partialorder %v1097_v24, %v1142_v57 }
 0x161   :  { %346 = vperm.xlu2 %846, %v1027_v55   ;;  %334 = vperm.xlu1 %845, %v1027_v55  }
 0x163   :  { %v226_v10 = vpop.permute.xlu1 %225 }
 0x164   :  { %vm365_vm9 = vcmp.eq.f32.partialorder %v226_v10, %v1142_v57 }
 0x165   :  { %v766_v21 = vsel %vm365_vm9, 1.0, %v861_v6 }
 0x166   :  { %v497_v42 = vpop.permute.xlu0 %496 }
 0x167   :  { %v649_v43 = vmul.f32 %v762_v36, %v497_v42 }
 0x169   :  { %847 = vset.pattern.permute.xlu2 %v1022_v54  ;;  %849 = vset.pattern.permute.xlu1 %v922_v14 }
 0x171   :  { %580 = vperm.xlu2 %847, %v938_v29   ;;  %340 = vperm.xlu1 %849, %v1027_v55   ;;  %v655_v55 = vmul.f32 %v768_v63, %v1084_v19  ;;  %v653_v19 = vmul.f32 %v766_v21, %v1079_v18  ;;  %v650_v18 = vmul.f32 %v763_v38, %v1109_v31 }
 0x172   :  { %v670_v63 = vmul.f32 %v783_v61, %v1075_v16 }
 0x173   :  { %v244_v11 = vpop.permute.xlu1 %243 }
 0x174   :  { %vm368_vm8 = vcmp.eq.f32.partialorder %v244_v11, %v1142_v57 }
 0x175   :  { %v769_v0 = vsel %vm368_vm8, 1.0, %v861_v6 }
 0x176   :  { %v656_v14 = vmul.f32 %v769_v0, %v1058_v8  ;;  %v654_v8 = vmul.f32 %v767_v1, %v1091_v22  ;;  %v651_v22 = vmul.f32 %v764_v37, %v1103_v26  ;;  %v569_v37 = vpop.permute.xlu0 %568 }
 0x178   :  { %675 = vmatpush.msra.mxu1 %v656_v14 }
 0x179   :  { %851 = vset.pattern.permute.xlu2 %v995_v46  ;;  %850 = vset.pattern.permute.xlu1 %v1013_v51  ;;  %v652_v46 = vmul.f32 %v765_v30, %v1077_v17  ;;  %v1187_v17 = vpop.permute.xlu2 %262 }
 0x17a   :  { %676 = vmatpush.msra.mxu1 %v655_v55 }
 0x17c   :  { %677 = vmatpush.msra.mxu1 %v654_v8 }
 0x17e   :  { %678 = vmatpush.msra.mxu1 %v653_v19 }
 0x180   :  { %679 = vmatpush.msra.mxu1 %v652_v46 }
 0x181   :  { %490 = vperm.xlu2 %851, %v933_v27   ;;  %574 = vperm.xlu1 %850, %v938_v29   ;;  %v1191_v26 = vpop.permute.xlu2 %280 }
 0x182   :  { %680 = vmatpush.msra.mxu1 %v651_v22  ;;  %vm374_vm11 = vcmp.eq.f32.partialorder %v1191_v26, %v1117_v34 }
 0x183   :  { %v1199_v45 = vpop.permute.xlu1 %256  ;;  %v775_v30 = vsel %vm374_vm11, 1.0, %v861_v6 }
 0x184   :  { %681 = vmatpush.msra.mxu1 %v650_v18 }
 0x186   :  { %682 = vmatpush.msra.mxu1 %v649_v43  ;;  %v473_v43 = vpop.permute.xlu0 %472 }
 0x189   :  { %854 = vset.pattern.permute.xlu2 %v1016_v52  ;;  %853 = vset.pattern.permute.xlu1 %v1022_v54 }
 0x18b   :  { %v293_v31 = vpop.permute.xlu2 %292 }
 0x18c   :  { %vm376_vm9 = vcmp.eq.f32.partialorder %v293_v31, %v1117_v34  ;;  %v758_v31 = vsel %vm357_vm3, 1.0, %v861_v6 }
 0x18d   :  { %v777_v7 = vsel %vm376_vm9, 1.0, %v861_v6  ;;  %vm787_vm9 = vmneg %vm16_vm0 }
 0x191   :  { %562 = vperm.xlu2 %854, %v938_v29   ;;  %484 = vperm.xlu1 %853, %v933_v27  }
 0x199   :  { %856 = vset.pattern.permute.xlu2 %v1009_v48  ;;  %855 = vset.pattern.permute.xlu1 %v1013_v51  ;;  %v275_v51 = vpop.permute.xlu1 %274 }
 0x19a   :  { %vm373_vm12 = vcmp.eq.f32.partialorder %v275_v51, %v1117_v34  ;;  %v461_v51 = vpop.permute.xlu0 %460 }
 0x19b   :  { %v311_v54 = vpop.permute.xlu2 %310 }
 0x19c   :  { %vm379_vm7 = vcmp.eq.f32.partialorder %v311_v54, %v1117_v34 }
 0x19d   :  { %v780_v14 = vsel %vm379_vm7, 1.0, %v861_v6  ;;  %vm789_vm7 = vmneg %vm17_vm1 }
 0x19e   :  { %v667_v55 = vmul.f32 %v780_v14, %v1068_v13 }
 0x1a1   :  { %556 = vperm.xlu2 %856, %v938_v29   ;;  %478 = vperm.xlu1 %855, %v933_v27  }
 0x1a9   :  { %858 = vset.pattern.permute.xlu2 %v1016_v52  ;;  %857 = vset.pattern.permute.xlu1 %v900_v5  ;;  %v287_v5 = vpop.permute.xlu1 %286 }
 0x1aa   :  { %vm375_vm10 = vcmp.eq.f32.partialorder %v287_v5, %v1117_v34 }
 0x1ab   :  { %v323_v48 = vpop.permute.xlu2 %322  ;;  %v776_v13 = vsel %vm375_vm10, 1.0, %v861_v6 }
 0x1ac   :  { %vm381_vm5 = vcmp.eq.f32.partialorder %v323_v48, %v1117_v34  ;;  %v645_v48 = vmul.f32 %v758_v31, %v473_v43 }
 0x1ad   :  { %v782_v11 = vsel %vm381_vm5, 1.0, %v861_v6  ;;  %vm355_vm5 = vcmp.eq.f32.partialorder %v1119_v35, %v1142_v57 }
 0x1ae   :  { %v756_v24 = vsel %vm355_vm5, 1.0, %v861_v6 }
 0x1b1   :  { %466 = vperm.xlu2 %858, %v933_v27   ;;  %550 = vperm.xlu1 %857, %v938_v29  }
 0x1b3   :  { %v305_v50 = vpop.permute.xlu1 %304 }
 0x1b4   :  { %vm378_vm8 = vcmp.eq.f32.partialorder %v305_v50, %v1117_v34 }
 0x1b9   :  { %454 = vperm.xlu1 %857, %v933_v27   ;;  %v761_v27 = vsel %vm360_vm15, 1.0, %v861_v6  ;;  %vm359_vm15 = vcmp.eq.f32.partialorder %v1138_v39, %v1142_v57 }
 0x1ba   :  { %v760_v18 = vsel %vm359_vm15, 1.0, %v861_v6 }
 0x1bb   :  { %v347_v47 = vpop.permute.xlu2 %346 }
 0x1bc   :  { %vm385_vm14 = vcmp.eq.f32.partialorder %v347_v47, %v1117_v34 }
 0x1bd   :  { %v786_v49 = vsel %vm385_vm14, 1.0, %v861_v6  ;;  %vm371_vm14 = vcmp.eq.f32.partialorder %v1187_v17, %v1117_v34 }
 0x1be   :  { %v673_v52 = vmul.f32 %v786_v49, %v1050_v2  ;;  %v772_v22 = vsel %vm371_vm14, 1.0, %v861_v6  ;;  %v643_v49 = vmul.f32 %v756_v24, %v461_v51 }
 0x1c0   :  { %694 = vmatpush.msra.mxu2 %v673_v52 }
 0x1c3   :  { %v317_v40 = vpop.permute.xlu1 %316 }
 0x1c4   :  { %vm380_vm6 = vcmp.eq.f32.partialorder %v317_v40, %v1117_v34 }
 0x1c5   :  { %v781_v0 = vsel %vm380_vm6, 1.0, %v861_v6  ;;  %vm370_vm6 = vcmp.eq.f32.partialorder %v1199_v45, %v1117_v34 }
 0x1c6   :  { %v668_v1 = vmul.f32 %v781_v0, %v1061_v9  ;;  %v664_v9 = vmul.f32 %v777_v7, %v1086_v20  ;;  %v771_v52 = vsel %vm370_vm6, 1.0, %v861_v6 }
 0x1cb   :  { %v581_v53 = vpop.permute.xlu2 %580 }
 0x1cc   :  { %v663_v8 = vmul.f32 %v776_v13, %v581_v53 }
 0x1d3   :  { %v335_v29 = vpop.permute.xlu1 %334 }
 0x1d4   :  { %vm383_vm2 = vcmp.eq.f32.partialorder %v335_v29, %v1117_v34 }
 0x1d5   :  { %v784_v2 = vsel %vm383_vm2, 1.0, %v861_v6  ;;  %vm358_vm2 = vcmp.eq.f32.partialorder %v1105_v28, %v1142_v57 }
 0x1d6   :  { %v671_v10 = vmul.f32 %v784_v2, %v1066_v12  ;;  %v779_v12 = vsel %vm378_vm8, 1.0, %v861_v6  ;;  %v759_v26 = vsel %vm358_vm2, 1.0, %v861_v6  ;;  %vm354_vm8 = vcmp.eq.f32.partialorder %v1099_v25, %v1142_v57 }
 0x1d7   :  { %v666_v16 = vmul.f32 %v779_v12, %v1095_v23  ;;  %v774_v23 = vsel %vm373_vm12, 1.0, %v861_v6  ;;  %v755_v50 = vsel %vm354_vm8, 1.0, %v861_v6 }
 0x1d8   :  { %v661_v20 = vmul.f32 %v774_v23, %v569_v37 }
 0x1db   :  { %v491_v58 = vpop.permute.xlu2 %490 }
 0x1dc   :  { %v648_v59 = vmul.f32 %v761_v27, %v491_v58 }
 0x1de   :  { %683 = vmatpush.msra.mxu1 %v648_v59 }
 0x1e3   :  { %v341_v60 = vpop.permute.xlu1 %340 }
 0x1e4   :  { %vm384_vm4 = vcmp.eq.f32.partialorder %v341_v60, %v1117_v34 }
 0x1e5   :  { %v785_v62 = vsel %vm384_vm4, 1.0, %v861_v6  ;;  %vm356_vm4 = vcmp.eq.f32.partialorder %v1133_v44, %v1142_v57 }
 0x1e6   :  { %v672_v32 = vmul.f32 %v785_v62, %v1030_v56  ;;  %v669_v56 = vmul.f32 %v782_v11, %v1070_v15  ;;  %v757_v28 = vsel %vm356_vm4, 1.0, %v861_v6 }
 0x1e8   :  { %695 = vmatpush.msra.mxu2 %v672_v32 }
 0x1ea   :  { %696 = vmatpush.msra.mxu2 %v671_v10 }
 0x1eb   :  { %v563_v15 = vpop.permute.xlu2 %562 }
 0x1ec   :  { %697 = vmatpush.msra.mxu2 %v670_v63 }
 0x1ee   :  { %698 = vmatpush.msra.mxu2 %v669_v56 }
 0x1f0   :  { %699 = vmatpush.msra.mxu2 %v668_v1 }
 0x1f2   :  { %700 = vmatpush.msra.mxu2 %v667_v55 }
 0x1f3   :  { %v575_v21 = vpop.permute.xlu1 %574 }
 0x1f4   :  { %701 = vmatpush.msra.mxu2 %v666_v16  ;;  %v662_v19 = vmul.f32 %v775_v30, %v575_v21 }
 0x1f6   :  { %702 = vmatpush.msra.mxu2 %v1125_v41  ;;  %v773_v41 = vsel %vm372_vm13, 1.0, %v861_v6 }
 0x1f7   :  { %v660_v38 = vmul.f32 %v773_v41, %v563_v15 }
 0x1f8   :  { %703 = vmatpush.msra.mxu2 %v664_v9 }
 0x1fa   :  { %704 = vmatpush.msra.mxu2 %v663_v8 }
 0x1fb   :  { %v557_v46 = vpop.permute.xlu2 %556 }
 0x1fc   :  { %705 = vmatpush.msra.mxu2 %v662_v19  ;;  %v659_v42 = vmul.f32 %v772_v22, %v557_v46 }
 0x1fe   :  { %706 = vmatpush.msra.mxu2 %v661_v20 }
 0x200   :  { %707 = vmatpush.msra.mxu2 %v660_v38 }
 0x202   :  { %708 = vmatpush.msra.mxu2 %v659_v42 }
 0x203   :  { %v485_v33 = vpop.permute.xlu1 %484 }
 0x204   :  { %v647_v36 = vmul.f32 %v760_v18, %v485_v33 }
 0x206   :  { %684 = vmatpush.msra.mxu1 %v647_v36 }
 0x20b   :  { %v467_v54 = vpop.permute.xlu2 %466 }
 0x20c   :  { %v644_v47 = vmul.f32 %v757_v28, %v467_v54 }
 0x213   :  { %v479_v17 = vpop.permute.xlu1 %478 }
 0x214   :  { %v646_v39 = vmul.f32 %v759_v26, %v479_v17 }
 0x216   :  { %685 = vmatpush.msra.mxu1 %v646_v39 }
 0x218   :  { %686 = vmatpush.msra.mxu1 %v645_v48 }
 0x21a   :  { %687 = vmatpush.msra.mxu1 %v644_v47 }
 0x21c   :  { %688 = vmatpush.msra.mxu1 %v643_v49 }
 0x223   :  { %v551_v44 = vpop.permute.xlu1 %550 }
 0x224   :  { %v658_v5 = vmul.f32 %v771_v52, %v551_v44 }
 0x226   :  { %709 = vmatpush.msra.mxu2 %v658_v5 }
 0x227   :  { %790 = vmatmul.msk.f32.vlgmr.msra.gmra.mxu2 %vm789_vm7, %v896_v4 }
 0x22b   :  { %v455_v35 = vpop.permute.xlu1 %454 }
 0x22c   :  { %v642_v40 = vmul.f32 %v755_v50, %v455_v35 }
 0x22e   :  { %689 = vmatpush.msra.mxu1 %v642_v40 }
 0x22f   :  { %788 = vmatmul.msk.f32.vlgmr.msra.gmra.mxu1 %vm787_vm9, %v891_v3 }
 0x2aa   :  { %v711_v34 = vpop.f32.mrf.mxu2 }
 0x2ab   :  { %715 = vst [vmem:[%s1285_s3 + $0x8] sm:$0xff] %v711_v34 }
 0x2ac   :  { %v691_v4 = vpop.f32.mrf.mxu1 }
 0x2ad   :  { %714 = vst [vmem:[%s1285_s3] sm:$0xff] %v691_v4 }

</bundles_post_ra>
